<compile_context>
chip_gen: v7x
topology: tpu7x:2x2x1
jax: 0.10.0
libtpu: 0.0.40
codegen_flags: <defaults>
</compile_context>

<pallas_src>
import functools

import jax
import jax.numpy as jnp
from jax.experimental import pallas as pl
from jax.experimental.pallas import tpu as pltpu

LANES = 128
SUBLANES = 8
# Per-input, per-grid-step DMA target.  4 MiB keeps per-step pipeline
# overhead ~5% on v6e (~1.4 TB/s) and is still a large win on v7x (3.2 TB/s)
# while fitting comfortably in every chip's VMEM when double-buffered.
TARGET_BLOCK_BYTES = 4 * 1024 * 1024


def _round_up(x, m):
    return ((x + m - 1) // m) * m


def _masked_mse_kernel(pred_ref, target_ref, out_ref, *,
                       valid_rows, need_row_mask):
    t = target_ref[...].astype(jnp.float32)
    p = pred_ref[...].astype(jnp.float32)

    mask = t > 0.0
    if need_row_mask:
        # Last block may extend past the array: mask out-of-bounds rows.
        # Statically elided when the grid tiles the array exactly; otherwise
        # ~3 VALU ops/element, hidden under the HBM-bound stream.
        tile_rows = t.shape[0]
        row = (pl.program_id(0) * tile_rows
               + jax.lax.broadcasted_iota(jnp.int32, t.shape, 0))
        mask = jnp.logical_and(mask, row < valid_rows)

    # Keep the select (jnp.where): OOB / stale tile contents must never be
    # multiplied in.
    d = jnp.where(mask, t - p, 0.0)
    sq = d * d
    cnt = mask.astype(jnp.float32)

    # Reduce (tile_rows, 128) -> (8, 128) with pure vreg adds (no XLU, no
    # scalar RAW chain); the cross-lane/sublane reduction is deferred to the
    # tiny wrapper-side sum.  Counts are exact in f32 (each entry <=
    # tile_rows/8 <= 4096 << 2^24).
    sq8 = jnp.sum(sq.reshape(-1, SUBLANES, LANES), axis=0)
    cnt8 = jnp.sum(cnt.reshape(-1, SUBLANES, LANES), axis=0)

    # Single fused lane-dense (8, 256) output per step: halves the output
    # stores / double-buffers and lets XLA fuse one final reduction.
    out_ref[:, :LANES] = sq8
    out_ref[:, LANES:] = cnt8


@jax.jit
def masked_mse_loss(pred, target):
    assert pred.ndim == target.ndim, "inconsistent dimensions"
    assert pred.shape == target.shape, "inconsistent shapes"

    total = pred.size
    pred_flat = pred.reshape(-1)      # free layout reshape
    target_flat = target.reshape(-1)

    # Pad only to the next lane multiple (no-op for typical NCHW sizes:
    # padded target entries are 0 -> excluded by the (target > 0) mask).
    # TODO(synk): for total % 128 != 0 this still costs one extra HBM pass
    # (XLA pad copy); a true zero-copy ragged tail needs 1-D Mosaic blocks,
    # which are not robust enough to rely on here.
    pad = (-total) % LANES
    if pad:
        pred_flat = jnp.pad(pred_flat, (0, pad))
        target_flat = jnp.pad(target_flat, (0, pad))
    rows = (total + pad) // LANES

    # Dtype-aware tiling: keep per-step DMA at TARGET_BLOCK_BYTES per input
    # regardless of element width, and keep rows a multiple of the sublane
    # packing granule (8 for f32, 16 for bf16, 32 for int8/fp8).
    item_lo = min(jnp.dtype(pred.dtype).itemsize,
                  jnp.dtype(target.dtype).itemsize)
    item_hi = max(jnp.dtype(pred.dtype).itemsize,
                  jnp.dtype(target.dtype).itemsize)
    row_align = max(SUBLANES, 32 // item_lo)
    max_tile_rows = max(
        row_align,
        (TARGET_BLOCK_BYTES // (LANES * item_hi)) // row_align * row_align)

    # Cap the tile so grid_n >= 2 whenever the data allows: on v7x both
    # TensorCores then get grid steps under the "parallel" axis.
    half_rows = _round_up(-(-rows // 2), row_align)
    tile_rows = max(row_align, min(max_tile_rows, half_rows))
    grid_n = -(-rows // tile_rows)
    need_row_mask = (grid_n * tile_rows) != rows

    pred2d = pred_flat.reshape(rows, LANES)      # free layout reshape
    target2d = target_flat.reshape(rows, LANES)

    # Explicit VMEM budget: 2 inputs x 2 buffers x block + 25% headroom,
    # floored at the usual scoped default, capped below v7x's 64 MiB/TC.
    block_bytes = tile_rows * LANES * item_hi
    vmem_limit = int(2 * 2 * block_bytes * 1.25) + (1 << 20)
    vmem_limit = min(48 << 20, max(16 << 20, vmem_limit))

    kernel = functools.partial(
        _masked_mse_kernel, valid_rows=rows, need_row_mask=need_row_mask)

    partials = pl.pallas_call(
        kernel,
        out_shape=jax.ShapeDtypeStruct((grid_n * SUBLANES, 2 * LANES),
                                       jnp.float32),
        grid_spec=pltpu.PrefetchScalarGridSpec(
            num_scalar_prefetch=0,
            grid=(grid_n,),
            in_specs=[
                pl.BlockSpec((tile_rows, LANES), lambda i: (i, 0)),
                pl.BlockSpec((tile_rows, LANES), lambda i: (i, 0)),
            ],
            out_specs=pl.BlockSpec((SUBLANES, 2 * LANES), lambda i: (i, 0)),
        ),
        compiler_params=pltpu.CompilerParams(
            # TODO(synk): if an xprof trace on v7x shows only one TensorCore
            # active, switch this axis to pltpu.CORE_PARALLEL.
            dimension_semantics=("parallel",),
            vmem_limit_bytes=vmem_limit,
        ),
    )(pred2d, target2d)

    # Tiny (grid_n*8, 256) final reduction.  Count partials are exact f32;
    # the final f32 sum is exact up to 2^24 valid elements and has ~1e-7
    # relative error beyond that (fine for a loss denominator).
    sq_sum = jnp.sum(partials[:, :LANES])
    cnt_sum = jnp.sum(partials[:, LANES:])
    return sq_sum / cnt_sum


def _reference(pred, target):
    mask = target > 0
    diff = jnp.where(mask, target - pred, 0.0)
    return jnp.sum(diff * diff) / jnp.sum(mask.astype(jnp.float32))


if __name__ == "__main__":
    key = jax.random.PRNGKey(0)
    k1, k2 = jax.random.split(key)

    # NCHW, small shapes; target has a mix of positive and non-positive
    # entries so the mask is non-trivial.
    shape = (2, 4, 16, 16)
    pred = jax.random.normal(k1, shape, dtype=jnp.float32)
    target = jax.random.normal(k2, shape, dtype=jnp.float32)

    loss = masked_mse_loss(pred, target)
    jax.block_until_ready(loss)

    ref = _reference(pred, target)
    assert jnp.allclose(loss, ref, rtol=1e-5, atol=1e-6), (loss, ref)

    print("KERNEL_OK")
</pallas_src>

<mosaic_0001>
module attributes {stable_mosaic.version = 11 : i64} {
  func.func @_masked_mse_kernel(%arg0: i32, %arg1: memref<8x128xf32, #tpu.memory_space<vmem>>, %arg2: memref<8x128xf32, #tpu.memory_space<vmem>>, %arg3: memref<8x256xf32, #tpu.memory_space<vmem>>) attributes {dimension_semantics = [#tpu.dimension_semantics<parallel>], iteration_bounds = array<i64: 2>, scalar_prefetch = 0 : i64, scratch_operands = 0 : i64, tpu.core_type = #tpu.core_type<tc>, window_params = [{transform_indices = @transform_0, window_bounds = array<i64: 8, 128>}, {transform_indices = @transform_1, window_bounds = array<i64: 8, 128>}, {transform_indices = @transform_2, window_bounds = array<i64: 8, 256>}]} {
    %c0 = arith.constant 0 : index
    %c0_0 = arith.constant 0 : index
    %0 = vector.load %arg2[%c0, %c0_0] : memref<8x128xf32, #tpu.memory_space<vmem>>, vector<8x128xf32>
    %c0_1 = arith.constant 0 : index
    %c0_2 = arith.constant 0 : index
    %1 = vector.load %arg1[%c0_1, %c0_2] : memref<8x128xf32, #tpu.memory_space<vmem>>, vector<8x128xf32>
    %cst = arith.constant 0.000000e+00 : f32
    %2 = vector.broadcast %cst : f32 to vector<8x128xf32>
    %3 = arith.cmpf ogt, %0, %2 : vector<8x128xf32>
    %4 = arith.subf %0, %1 : vector<8x128xf32>
    %cst_3 = arith.constant 0.000000e+00 : f32
    %5 = vector.broadcast %cst_3 : f32 to vector<8x128xf32>
    %6 = arith.select %3, %4, %5 : vector<8x128xi1>, vector<8x128xf32>
    %7 = arith.mulf %6, %6 : vector<8x128xf32>
    %8 = arith.extui %3 : vector<8x128xi1> to vector<8x128xi32>
    %9 = arith.sitofp %8 : vector<8x128xi32> to vector<8x128xf32>
    %10 = vector.shape_cast %7 : vector<8x128xf32> to vector<1x8x128xf32>
    %cst_4 = arith.constant dense<0.000000e+00> : vector<8x128xf32>
    %11 = vector.multi_reduction <add>, %10, %cst_4 [0] : vector<1x8x128xf32> to vector<8x128xf32>
    %12 = vector.shape_cast %9 : vector<8x128xf32> to vector<1x8x128xf32>
    %cst_5 = arith.constant dense<0.000000e+00> : vector<8x128xf32>
    %13 = vector.multi_reduction <add>, %12, %cst_5 [0] : vector<1x8x128xf32> to vector<8x128xf32>
    %c0_6 = arith.constant 0 : index
    %c0_7 = arith.constant 0 : index
    %14 = vector.load %arg3[%c0_6, %c0_7] : memref<8x256xf32, #tpu.memory_space<vmem>>, vector<8x128xf32>
    tpu.vector_store %arg3[%c0_6, %c0_7], %11 {strides = array<i32>} : memref<8x256xf32, #tpu.memory_space<vmem>>, vector<8x128xf32>,
    %c0_8 = arith.constant 0 : index
    %c128 = arith.constant 128 : index
    %15 = vector.load %arg3[%c0_8, %c128] : memref<8x256xf32, #tpu.memory_space<vmem>>, vector<8x128xf32>
    tpu.vector_store %arg3[%c0_8, %c128], %13 {strides = array<i32>} : memref<8x256xf32, #tpu.memory_space<vmem>>, vector<8x128xf32>,
    return
  }
  func.func @transform_0(%arg0: i32) -> (i32, i32) {
    %c0_i32 = arith.constant 0 : i32
    %c0_i32_0 = arith.constant 0 : i32
    return %arg0, %c0_i32 : i32, i32
  }
  func.func @transform_1(%arg0: i32) -> (i32, i32) {
    %c0_i32 = arith.constant 0 : i32
    %c0_i32_0 = arith.constant 0 : i32
    return %arg0, %c0_i32 : i32, i32
  }
  func.func @transform_2(%arg0: i32) -> (i32, i32) {
    %c0_i32 = arith.constant 0 : i32
    %c0_i32_0 = arith.constant 0 : i32
    return %arg0, %c0_i32 : i32, i32
  }
}

</mosaic_0001>

<bundles_post_ra>
// kernel: masked_mse_loss.1
= control target key start
LH: loop header
LB: loop body
LE: loop exit
PB: predicated region body
PF: predicated region fallthrough
CT: control target
= control target key end

     0   :  { %s283_s9 = smov 0   ;;  %s297_s0 = inlined_call_operand.vmem [shape: f32[16,128], index: 0, kind: input, shape index: {}]   ;;  %s298_s1 = inlined_call_operand.vmem [shape: f32[16,128], index: 1, kind: input, shape index: {}]   ;;  %s299_s2 = inlined_call_operand.vmem [shape: f32[16,256], index: 2, kind: output, shape index: {}]  }
   0x1 LB: > { %s237_s10 = sadd.s32 4294967295, %s265_s9   ;;  %p241_p0 = scmp.ge.s32.totalorder %s265_s9, 1  ;;  %s265_s9 = sphi %s283_s9, %s12_s9  }
   0x2   : > { %p120_p1 = scmp.lt.s32.totalorder %s265_s9, 3 }
   0x4   : > { %p121_p2 = pnand %p241_p0, %p120_p1 }
   0x5   : > { %p145_p3 = scmp.lt.s32.totalorder (!%p121_p2), %s237_s10, 1  ;;  %v267_v3 = vmov (!%p121_p2), 0.0  }
   0x6   : > { %124 = sbr.rel (%p121_p2) target bundleno = 24 (0x18), region = 28 }
   0xd   : > { %s301_s10 = smov (!%p145_p3, %s237_s10), 1 }
   0xe   : > { %s242_s11 = sshll.u32 %s301_s10, 3  ;;  %s249_s12 = sshll.u32 %s301_s10, 4 }
   0xf   : > { %s148_s15 = scalar_lea.vmem %s297_s0, %s242_s11  ;;  %s152_s18 = scalar_lea.vmem %s298_s1, %s242_s11 }
  0x10   : > { %s157_s21 = scalar_lea.vmem %s299_s2, %s249_s12  ;;  %v158_v0 = vld [vmem:[%s152_s18] sm:$0xff] }
  0x11   : > { %v159_v1 = vld [vmem:[%s148_s15] sm:$0xff]  ;;  %vm160_vm0 = vcmp.gt.f32.partialorder %v158_v0, 0.0 }
  0x12   : > { %v161_v2 = vsub.f32 %v158_v0, %v159_v1  ;;  %v246_v4 = vsel %vm160_vm0, 1.0, %v267_v3 }
  0x13   : > { %169 = vst [vmem:[%s157_s21 + $0x8] sm:$0xff] %v246_v4 }
  0x14   : > { %v162_v5 = vsel %vm160_vm0, %v161_v2, 0.0 }
  0x15   : > { %v163_v6 = vmul.f32 %v162_v5, %v162_v5 }
  0x17   : > { %168 = vst [vmem:[%s157_s21] sm:$0xff] %v163_v6 }
  0x18 PF: > { %s12_s9 = sadd.s32 1, %s265_s9  }
  0x19   : > { %p9_p4 = scmp.ge.s32.totalorder %s12_s9, 4  }
  0x1b   :  { %11 = sbr.rel (!%p9_p4) target bundleno = 1 (0x1), region = 61 }

</bundles_post_ra>
